<compile_context>
chip_gen: v5e
topology: v5e:2x2
jax: 0.10.0
libtpu: 0.0.40
codegen_flags: <defaults>
</compile_context>

<pallas_src>
import functools
import math

import jax
import jax.numpy as jnp
from jax.experimental import pallas as pl
from jax.experimental.pallas import tpu as pltpu

_SQRT_2_OVER_PI = 0.7978845608028654
_INV_SQRT2 = 0.7071067811865476


def _round_up(x, m):
    return ((x + m - 1) // m) * m


def _vmem_capacity_bytes():
    """Physical per-core VMEM; conservative 64 MiB fallback (v7x) if query fails."""
    try:
        info = pltpu.get_tpu_info()
        cap = getattr(info, "vmem_capacity_bytes", None)
        if cap:
            return int(cap)
    except Exception:
        pass
    return 64 * 1024 * 1024


def _gelu(h, approx):
    if approx:
        # tanh variant -> EUP slot (otherwise idle), default.
        return 0.5 * h * (1.0 + jnp.tanh(_SQRT_2_OVER_PI * (h + 0.044715 * h * h * h)))
    # exact erf variant matches nn.GELU() bit-for-bit semantics (opt-in).
    return 0.5 * h * (1.0 + jax.lax.erf(h * _INV_SQRT2))


def _mlp_kernel_resident(x_ref, w1_ref, b1_ref, w2_ref, b2_ref, o_ref, *, approx_gelu):
    """Whole hidden dim resident: one shot per row tile, weights fetched once globally."""
    h = jnp.dot(x_ref[...], w1_ref[...], preferred_element_type=jnp.float32)
    h = h + b1_ref[...]                      # (1, hid) f32 broadcast
    h = _gelu(h, approx_gelu)
    # Dropout(p=0.0) is identity -> no-op.
    o_ref[...] = (
        jnp.dot(h.astype(w2_ref.dtype), w2_ref[...], preferred_element_type=jnp.float32)
        + b2_ref[...]
    ).astype(o_ref.dtype)


def _mlp_kernel_tiled(x_ref, w1_ref, b1_ref, w2_ref, b2_ref, o_ref, *, approx_gelu):
    """Hidden dim tiled (reduction axis k): accumulate directly into the resident f32
    output block; b2 is the k==0 init value, no scratch accumulator, no epilogue."""
    k = pl.program_id(1)

    @pl.when(k == 0)
    def _():
        o_ref[...] = jnp.broadcast_to(b2_ref[...], o_ref.shape).astype(o_ref.dtype)

    h = jnp.dot(x_ref[...], w1_ref[...], preferred_element_type=jnp.float32)
    h = h + b1_ref[...]                      # (1, th) f32 broadcast
    h = _gelu(h, approx_gelu)
    o_ref[...] += jnp.dot(
        h.astype(w2_ref.dtype), w2_ref[...], preferred_element_type=jnp.float32
    )


@functools.partial(
    jax.jit, static_argnames=("tm", "th", "use_bf16", "approx_gelu", "force_tiled")
)
def mlp_forward(x, w1, b1, w2, b2, *, tm=512, th=1024, use_bf16=True,
                approx_gelu=True, force_tiled=False):
    """Fused (Linear -> GELU -> Linear) forward.  x: [..., in_feat] -> [..., out_feat] f32."""
    orig_shape = x.shape
    in_feat, hid_feat = w1.shape
    out_feat = w2.shape[1]
    assert tm % 8 == 0, "row tile must be a multiple of 8 sublanes"
    assert th % 128 == 0, "hidden tile must be a multiple of 128 lanes"

    b1 = b1.reshape(1, hid_feat).astype(jnp.float32)
    b2 = b2.reshape(1, out_feat).astype(jnp.float32)
    x2d = x.reshape(-1, in_feat)
    m = x2d.shape[0]

    # ---- lane-dense padding of feature dims (exact: zero cols/rows contribute 0) ----
    in_pad = _round_up(in_feat, 128)
    out_pad = _round_up(out_feat, 128)
    hid_pad = _round_up(hid_feat, 128)

    # ---- row tiling: clamp for tiny inputs; split a single tile so both v7x TCs work --
    tm_eff = min(tm, _round_up(m, 8))
    m_pad = _round_up(m, tm_eff)
    if m > 8 and m_pad // tm_eff == 1:
        tm_eff = _round_up((m + 1) // 2, 8)
        m_pad = _round_up(m, tm_eff)

    # ---- VMEM budget (generation-aware): physical minus 16 MiB headroom --------------
    vmem_cap = _vmem_capacity_bytes()
    vmem_limit = max(32 * 1024 * 1024, vmem_cap - 16 * 1024 * 1024)

    mm_dtype = jnp.bfloat16 if use_bf16 else jnp.float32
    mm_bytes = 2 if use_bf16 else 4

    # Working set if the full hidden dim is resident (2x = double buffers).
    resident_bytes = (
        2 * tm_eff * in_pad * mm_bytes
        + 2 * (in_pad * hid_pad + hid_pad * out_pad) * mm_bytes
        + 2 * (hid_pad + out_pad) * 4
        + 2 * tm_eff * out_pad * 4
        + tm_eff * hid_pad * 4          # f32 (tm, hid) intermediate (vregs / spill)
    )
    use_resident = (not force_tiled) and resident_bytes <= int(0.8 * vmem_limit)

    if use_resident:
        th_eff = hid_pad
    else:
        th_eff = min(th, hid_pad)
        hid_pad = _round_up(hid_feat, th_eff)

    # ---- apply padding ----------------------------------------------------------------
    if m_pad != m or in_pad != in_feat:
        x2d = jnp.pad(x2d, ((0, m_pad - m), (0, in_pad - in_feat)))
    if in_pad != in_feat or hid_pad != hid_feat:
        w1 = jnp.pad(w1, ((0, in_pad - in_feat), (0, hid_pad - hid_feat)))
    if hid_pad != hid_feat:
        b1 = jnp.pad(b1, ((0, 0), (0, hid_pad - hid_feat)))
    if hid_pad != hid_feat or out_pad != out_feat:
        w2 = jnp.pad(w2, ((0, hid_pad - hid_feat), (0, out_pad - out_feat)))
    if out_pad != out_feat:
        b2 = jnp.pad(b2, ((0, 0), (0, out_pad - out_feat)))

    x2d = x2d.astype(mm_dtype)
    w1 = w1.astype(mm_dtype)
    w2 = w2.astype(mm_dtype)

    out_shape = jax.ShapeDtypeStruct((m_pad, out_pad), jnp.float32)

    if use_resident:
        # 1-D grid over row tiles; weight index maps are constant -> fetched once.
        grid = (m_pad // tm_eff,)
        out = pl.pallas_call(
            functools.partial(_mlp_kernel_resident, approx_gelu=approx_gelu),
            out_shape=out_shape,
            grid_spec=pltpu.PrefetchScalarGridSpec(
                num_scalar_prefetch=0,
                grid=grid,
                in_specs=[
                    pl.BlockSpec((tm_eff, in_pad), lambda i: (i, 0)),
                    pl.BlockSpec((in_pad, hid_pad), lambda i: (0, 0)),
                    pl.BlockSpec((1, hid_pad), lambda i: (0, 0)),
                    pl.BlockSpec((hid_pad, out_pad), lambda i: (0, 0)),
                    pl.BlockSpec((1, out_pad), lambda i: (0, 0)),
                ],
                out_specs=pl.BlockSpec((tm_eff, out_pad), lambda i: (i, 0)),
            ),
            compiler_params=pltpu.CompilerParams(
                dimension_semantics=("parallel",),
                vmem_limit_bytes=vmem_limit,
            ),
        )(x2d, w1, b1, w2, b2)
    else:
        # 2-D grid (row tiles, hidden slabs); accumulate into the resident output block.
        grid = (m_pad // tm_eff, hid_pad // th_eff)
        out = pl.pallas_call(
            functools.partial(_mlp_kernel_tiled, approx_gelu=approx_gelu),
            out_shape=out_shape,
            grid_spec=pltpu.PrefetchScalarGridSpec(
                num_scalar_prefetch=0,
                grid=grid,
                in_specs=[
                    pl.BlockSpec((tm_eff, in_pad), lambda i, k: (i, 0)),
                    pl.BlockSpec((in_pad, th_eff), lambda i, k: (0, k)),
                    pl.BlockSpec((1, th_eff), lambda i, k: (0, k)),
                    pl.BlockSpec((th_eff, out_pad), lambda i, k: (k, 0)),
                    pl.BlockSpec((1, out_pad), lambda i, k: (0, 0)),
                ],
                out_specs=pl.BlockSpec((tm_eff, out_pad), lambda i, k: (i, 0)),
            ),
            compiler_params=pltpu.CompilerParams(
                dimension_semantics=("parallel", "arbitrary"),
                vmem_limit_bytes=vmem_limit,
            ),
        )(x2d, w1, b1, w2, b2)

    return out[:m, :out_feat].reshape(*orig_shape[:-1], out_feat)


def init_mlp_params(key, in_feat, hid_feat=None, out_feat=None):
    """Deterministic init mirroring nn.Linear default (uniform +/- 1/sqrt(fan_in))."""
    if not hid_feat:
        hid_feat = in_feat
    if not out_feat:
        out_feat = in_feat
    k1, k2, k3, k4 = jax.random.split(key, 4)
    bound1 = 1.0 / math.sqrt(in_feat)
    bound2 = 1.0 / math.sqrt(hid_feat)
    # stored as [in, out] (transpose of PyTorch's [out, in])
    w1 = jax.random.uniform(k1, (in_feat, hid_feat), jnp.float32, -bound1, bound1)
    b1 = jax.random.uniform(k2, (1, hid_feat), jnp.float32, -bound1, bound1)
    w2 = jax.random.uniform(k3, (hid_feat, out_feat), jnp.float32, -bound2, bound2)
    b2 = jax.random.uniform(k4, (1, out_feat), jnp.float32, -bound2, bound2)
    return w1, b1, w2, b2


def _reference(x2d, w1, b1, w2, b2, approximate=False):
    hp = jax.lax.Precision.HIGHEST
    h = jax.nn.gelu(jnp.dot(x2d, w1, precision=hp) + b1.reshape(1, -1),
                    approximate=approximate)
    return jnp.dot(h, w2, precision=hp) + b2.reshape(1, -1)


if __name__ == "__main__":
    # TODO(synk): this kernel covers the MLP sub-module of ViTGenerator; attention, SLN
    # (self-modulated LayerNorm) and the SIREN output head would be separate kernels and
    # are not implemented here.
    key = jax.random.PRNGKey(0)

    # --- Test 1: small shapes consistent with the module's MLP (dim=32, mlp_ratio=4). ---
    B, S, DIM, HID = 2, 8, 32, 128
    kx, kp, kq = jax.random.split(key, 3)
    x = jax.random.normal(kx, (B, S, DIM), jnp.float32)
    w1, b1, w2, b2 = init_mlp_params(kp, DIM, HID, DIM)
    x2d = x.reshape(-1, DIM)

    # Default fast path: bf16 operands (f32 accumulation) + tanh GELU, weights resident.
    y = mlp_forward(x, w1, b1, w2, b2)
    jax.block_until_ready(y)
    y_ref_tanh = _reference(x2d, w1, b1, w2, b2, approximate=True).reshape(B, S, DIM)
    assert y.shape == (B, S, DIM)
    assert jnp.allclose(y, y_ref_tanh, atol=5e-2, rtol=5e-2), "default (bf16/tanh) mismatch"

    # Bit-faithful path: f32 operands + exact erf GELU.
    y_exact = mlp_forward(x, w1, b1, w2, b2, use_bf16=False, approx_gelu=False)
    jax.block_until_ready(y_exact)
    y_ref = _reference(x2d, w1, b1, w2, b2, approximate=False).reshape(B, S, DIM)
    assert jnp.allclose(y_exact, y_ref, atol=1e-4, rtol=1e-4), "exact f32 mismatch"

    # --- Test 2: ViT-like 197 tokens -> exercises row padding, the dual-tile row split,
    #     lane padding, and (forced) the tiled hidden-reduction fallback path. ---
    B2, S2, DIM2, HID2 = 2, 197, 128, 384
    kx2, kp2 = jax.random.split(kq)
    x2 = jax.random.normal(kx2, (B2, S2, DIM2), jnp.float32)
    p2 = init_mlp_params(kp2, DIM2, HID2, DIM2)
    x2_2d = x2.reshape(-1, DIM2)

    y2 = mlp_forward(x2, *p2)   # default: resident weights, bf16, tanh GELU
    jax.block_until_ready(y2)
    y2_ref_tanh = _reference(x2_2d, *p2, approximate=True).reshape(B2, S2, DIM2)
    assert y2.shape == (B2, S2, DIM2)
    assert jnp.allclose(y2, y2_ref_tanh, atol=5e-2, rtol=5e-2), "default large-case mismatch"

    # Forced tiled-reduction fallback (accumulate-into-output path), exact numerics.
    y2_tiled = mlp_forward(x2, *p2, th=256, use_bf16=False, approx_gelu=False,
                           force_tiled=True)
    jax.block_until_ready(y2_tiled)
    y2_ref = _reference(x2_2d, *p2, approximate=False).reshape(B2, S2, DIM2)
    assert jnp.allclose(y2_tiled, y2_ref, atol=1e-3, rtol=1e-3), "tiled fallback mismatch"

    print("KERNEL_OK")
</pallas_src>

<mosaic_0001>
module attributes {stable_mosaic.version = 11 : i64} {
  func.func @_mlp_kernel_resident(%arg0: i32, %arg1: memref<8x128xbf16, #tpu.memory_space<vmem>>, %arg2: memref<128x128xbf16, #tpu.memory_space<vmem>>, %arg3: memref<1x128xf32, #tpu.memory_space<vmem>>, %arg4: memref<128x128xbf16, #tpu.memory_space<vmem>>, %arg5: memref<1x128xf32, #tpu.memory_space<vmem>>, %arg6: memref<8x128xf32, #tpu.memory_space<vmem>>) attributes {dimension_semantics = [#tpu.dimension_semantics<parallel>], iteration_bounds = array<i64: 2>, scalar_prefetch = 0 : i64, scratch_operands = 0 : i64, tpu.core_type = #tpu.core_type<tc>, window_params = [{transform_indices = @transform_0, window_bounds = array<i64: 8, 128>}, {pipeline_mode = #tpu.pipeline_mode<synchronous>, transform_indices = @transform_1, window_bounds = array<i64: 128, 128>}, {pipeline_mode = #tpu.pipeline_mode<synchronous>, transform_indices = @transform_2, window_bounds = array<i64: 1, 128>}, {pipeline_mode = #tpu.pipeline_mode<synchronous>, transform_indices = @transform_3, window_bounds = array<i64: 128, 128>}, {pipeline_mode = #tpu.pipeline_mode<synchronous>, transform_indices = @transform_4, window_bounds = array<i64: 1, 128>}, {transform_indices = @transform_5, window_bounds = array<i64: 8, 128>}]} {
    %c0 = arith.constant 0 : index
    %c0_0 = arith.constant 0 : index
    %0 = vector.load %arg1[%c0, %c0_0] : memref<8x128xbf16, #tpu.memory_space<vmem>>, vector<8x128xbf16>
    %c0_1 = arith.constant 0 : index
    %c0_2 = arith.constant 0 : index
    %1 = vector.load %arg2[%c0_1, %c0_2] : memref<128x128xbf16, #tpu.memory_space<vmem>>, vector<128x128xbf16>
    %cst = arith.constant dense<0.000000e+00> : vector<8x128xf32>
    %2 = tpu.matmul %0, %1, %cst {dimension_numbers = #tpu.dot_dimension_numbers<[1], [0], [0], [1], [0, 0, 1, 1], [], []>} : vector<8x128xbf16>, vector<128x128xbf16>, vector<8x128xf32> -> vector<8x128xf32>
    %c0_3 = arith.constant 0 : index
    %c0_4 = arith.constant 0 : index
    %3 = vector.load %arg3[%c0_3, %c0_4] : memref<1x128xf32, #tpu.memory_space<vmem>>, vector<1x128xf32>
    %4 = vector.broadcast %3 : vector<1x128xf32> to vector<8x128xf32>
    %5 = arith.addf %2, %4 : vector<8x128xf32>
    %cst_5 = arith.constant 5.000000e-01 : f32
    %6 = vector.broadcast %cst_5 : f32 to vector<8x128xf32>
    %7 = arith.mulf %6, %5 : vector<8x128xf32>
    %cst_6 = arith.constant 4.471500e-02 : f32
    %8 = vector.broadcast %cst_6 : f32 to vector<8x128xf32>
    %9 = arith.mulf %8, %5 : vector<8x128xf32>
    %10 = arith.mulf %9, %5 : vector<8x128xf32>
    %11 = arith.mulf %10, %5 : vector<8x128xf32>
    %12 = arith.addf %5, %11 : vector<8x128xf32>
    %cst_7 = arith.constant 0.797884583 : f32
    %13 = vector.broadcast %cst_7 : f32 to vector<8x128xf32>
    %14 = arith.mulf %13, %12 : vector<8x128xf32>
    %15 = math.tanh %14 : vector<8x128xf32>
    %cst_8 = arith.constant 1.000000e+00 : f32
    %16 = vector.broadcast %cst_8 : f32 to vector<8x128xf32>
    %17 = arith.addf %16, %15 : vector<8x128xf32>
    %18 = arith.mulf %7, %17 : vector<8x128xf32>
    %19 = arith.truncf %18 : vector<8x128xf32> to vector<8x128xbf16>
    %c0_9 = arith.constant 0 : index
    %c0_10 = arith.constant 0 : index
    %20 = vector.load %arg4[%c0_9, %c0_10] : memref<128x128xbf16, #tpu.memory_space<vmem>>, vector<128x128xbf16>
    %cst_11 = arith.constant dense<0.000000e+00> : vector<8x128xf32>
    %21 = tpu.matmul %19, %20, %cst_11 {dimension_numbers = #tpu.dot_dimension_numbers<[1], [0], [0], [1], [0, 0, 1, 1], [], []>} : vector<8x128xbf16>, vector<128x128xbf16>, vector<8x128xf32> -> vector<8x128xf32>
    %c0_12 = arith.constant 0 : index
    %c0_13 = arith.constant 0 : index
    %22 = vector.load %arg5[%c0_12, %c0_13] : memref<1x128xf32, #tpu.memory_space<vmem>>, vector<1x128xf32>
    %23 = vector.broadcast %22 : vector<1x128xf32> to vector<8x128xf32>
    %24 = arith.addf %21, %23 : vector<8x128xf32>
    %c0_14 = arith.constant 0 : index
    %c0_15 = arith.constant 0 : index
    %25 = vector.load %arg6[%c0_14, %c0_15] : memref<8x128xf32, #tpu.memory_space<vmem>>, vector<8x128xf32>
    tpu.vector_store %arg6[%c0_14, %c0_15], %24 {strides = array<i32>} : memref<8x128xf32, #tpu.memory_space<vmem>>, vector<8x128xf32>,
    return
  }
  func.func @transform_0(%arg0: i32) -> (i32, i32) {
    %c0_i32 = arith.constant 0 : i32
    %c0_i32_0 = arith.constant 0 : i32
    return %arg0, %c0_i32 : i32, i32
  }
  func.func @transform_1(%arg0: i32) -> (i32, i32) {
    %c0_i32 = arith.constant 0 : i32
    %c0_i32_0 = arith.constant 0 : i32
    %c0_i32_1 = arith.constant 0 : i32
    return %c0_i32, %c0_i32_0 : i32, i32
  }
  func.func @transform_2(%arg0: i32) -> (i32, i32) {
    %c0_i32 = arith.constant 0 : i32
    %c0_i32_0 = arith.constant 0 : i32
    %c0_i32_1 = arith.constant 0 : i32
    return %c0_i32, %c0_i32_0 : i32, i32
  }
  func.func @transform_3(%arg0: i32) -> (i32, i32) {
    %c0_i32 = arith.constant 0 : i32
    %c0_i32_0 = arith.constant 0 : i32
    %c0_i32_1 = arith.constant 0 : i32
    return %c0_i32, %c0_i32_0 : i32, i32
  }
  func.func @transform_4(%arg0: i32) -> (i32, i32) {
    %c0_i32 = arith.constant 0 : i32
    %c0_i32_0 = arith.constant 0 : i32
    %c0_i32_1 = arith.constant 0 : i32
    return %c0_i32, %c0_i32_0 : i32, i32
  }
  func.func @transform_5(%arg0: i32) -> (i32, i32) {
    %c0_i32 = arith.constant 0 : i32
    %c0_i32_0 = arith.constant 0 : i32
    return %arg0, %c0_i32 : i32, i32
  }
}

</mosaic_0001>

<bundles_post_ra>
// kernel: mlp_forward.1
= control target key start
LH: loop header
LB: loop body
LE: loop exit
PB: predicated region body
PF: predicated region fallthrough
CT: control target
= control target key end

     0   :  { %s586_s18 = smov 0   ;;  %s661_s0 = inlined_call_operand.vmem [shape: bf16[16,128], index: 0, kind: input, shape index: {}]   ;;  %s662_s1 = inlined_call_operand.vmem [shape: bf16[128,128], index: 1, kind: input, shape index: {}]   ;;  %s663_s2 = inlined_call_operand.vmem [shape: f32[1,128], index: 2, kind: input, shape index: {}]   ;;  %s664_s3 = inlined_call_operand.vmem [shape: bf16[128,128], index: 3, kind: input, shape index: {}]   ;;  %s665_s4 = inlined_call_operand.vmem [shape: f32[1,128], index: 4, kind: input, shape index: {}]   ;;  %s666_s5 = inlined_call_operand.vmem [shape: f32[16,128], index: 5, kind: output, shape index: {}]  }
   0x1 LB: > { %s447_s19 = sadd.s32 4294967295, %s554_s18   ;;  %p451_p0 = scmp.ge.s32.totalorder %s554_s18, 1  ;;  %s554_s18 = sphi %s586_s18, %s15_s18  }
   0x2   : > { %p186_p1 = scmp.lt.s32.totalorder %s554_s18, 3 }
   0x4   : > { %p187_p2 = pnand %p451_p0, %p186_p1 }
   0x5   : > { %p212_p3 = scmp.lt.s32.totalorder (!%p187_p2), %s447_s19, 1 }
   0x6   : > { %190 = sbr.rel (%p187_p2) target bundleno = 328 (0x148), region = 40 }
   0xb   : > { %v527_v0 = vld [vmem:[%s662_s1 + $0x38] sm:$0xff]  ;;  %v526_v1 = vld [vmem:[%s662_s1 + $0x30] sm:$0xff]  ;;  %v525_v4 = vld [vmem:[%s662_s1 + $0x28] sm:$0xff]  ;;  %s668_s19 = smov (!%p212_p3, %s447_s19), 1 }
   0xc   : > { %289 = vmatpush.bf16.msra.mxu0 %v527_v0  ;;  %v535_v2 = vld [vmem:[%s664_s3 + $0x38] sm:$0xff]  ;;  %v534_v3 = vld [vmem:[%s664_s3 + $0x30] sm:$0xff]  ;;  %v524_v5 = vld [vmem:[%s662_s1 + $0x20] sm:$0xff]  ;;  %s452_s13 = sshll.u32 %s668_s19, 2  ;;  %s453_s10 = sshll.u32 %s668_s19, 3 }
   0xd   : > { %380 = vmatpush.bf16.msra.mxu1 %v535_v2  ;;  %v523_v6 = vld [vmem:[%s662_s1 + $0x18] sm:$0xff]  ;;  %v522_v7 = vld [vmem:[%s662_s1 + $0x10] sm:$0xff]  ;;  %v521_v8 = vld [vmem:[%s662_s1 + $0x8] sm:$0xff]  ;;  %s215_s20 = scalar_lea.vmem %s661_s0, %s452_s13  ;;  %s219_s15 = scalar_lea.vmem %s666_s5, %s453_s10 }
   0xe   : > { %v520_v9 = vld [vmem:[%s662_s1] sm:$0xff]  ;;  %v533_v11 = vld [vmem:[%s664_s3 + $0x28] sm:$0xff]  ;;  %v531_v13 = vld [vmem:[%s664_s3 + $0x18] sm:$0xff] }
   0xf   : > { %v220_v10 = vld [vmem:[%s215_s20] sm:$0xf]  ;;  %v530_v14 = vld [vmem:[%s664_s3 + $0x10] sm:$0xff]  ;;  %v529_v15 = vld [vmem:[%s664_s3 + $0x8] sm:$0xff] }
  0x10   : > { %290 = vmatpush.bf16.msra.mxu0 %v526_v1  ;;  %v532_v12 = vld [vmem:[%s664_s3 + $0x20] sm:$0xff] }
  0x11   : > { %381 = vmatpush.bf16.msra.mxu1 %v534_v3  ;;  %v528_v16 = vld [vmem:[%s664_s3] sm:$0xff] }
  0x12   : > { %v544_v17 = vld [vmem:[%s663_s2] ss:$0 sm:$0xff] }
  0x13   : > { %v545_v31 = vld [vmem:[%s665_s4] ss:$0 sm:$0xff] }
  0x14   : > { %291 = vmatpush.bf16.msra.mxu0 %v525_v4 }
  0x15   : > { %382 = vmatpush.bf16.msra.mxu1 %v533_v11 }
  0x18   : > { %292 = vmatpush.bf16.msra.mxu0 %v524_v5 }
  0x19   : > { %383 = vmatpush.bf16.msra.mxu1 %v532_v12 }
  0x1c   : > { %293 = vmatpush.bf16.msra.mxu0 %v523_v6 }
  0x1d   : > { %384 = vmatpush.bf16.msra.mxu1 %v531_v13 }
  0x20   : > { %294 = vmatpush.bf16.msra.mxu0 %v522_v7 }
  0x21   : > { %385 = vmatpush.bf16.msra.mxu1 %v530_v14 }
  0x24   : > { %295 = vmatpush.bf16.msra.mxu0 %v521_v8 }
  0x25   : > { %386 = vmatpush.bf16.msra.mxu1 %v529_v15 }
  0x28   : > { %296 = vmatpush.bf16.msra.mxu0 %v520_v9 }
  0x29   : > { %387 = vmatpush.bf16.msra.mxu1 %v528_v16 }
  0x2b   : > { %297 = vmatmul.bf16.vlgmr.msra.gmra.mxu0 %v220_v10 }
  0xa8   : > { %v298_v18 = vpop.f32.mrf.mxu0 }
  0xa9   : > { %v299_v19 = vadd.f32 %v544_v17, %v298_v18 }
  0xab   : > { %v303_v20 = vmul.f32 0.044715, %v299_v19  ;;  %v302_v27 = vmul.f32 0.5, %v299_v19 }
  0xad   : > { %v304_v21 = vmul.f32 %v303_v20, %v299_v19 }
  0xaf   : > { %v305_v22 = vmul.f32 %v304_v21, %v299_v19 }
  0xb0   : > { %v300_v23 = vpop.f32.mrf.mxu0 }
  0xb1   : > { %v306_v24 = vadd.f32 %v305_v22, %v299_v19 }
  0xb3   : > { %v307_v25 = vmul.f32 0.7978846, %v306_v24 }
  0xb5   : > { %546 = vtanh.f32 %v307_v25 }
  0xbb   : > { %v547_v26 = vpop.eup %546 }
  0xbc   : > { %v309_v28 = vadd.f32 1.0, %v547_v26 }
  0xbe   : > { %v310_v29 = vmul.f32 %v309_v28, %v302_v27 }
  0xc0   : > { %v311_v30 = vpack.c.bf16 %v310_v29, %v310_v29 }
  0xc2   : > { %388 = vmatmul.bf16.vlgmr.msra.gmra.mxu1 %v311_v30 }
 0x13f   : > { %v389_v32 = vpop.f32.mrf.mxu1 }
 0x140   : > { %v390_v33 = vadd.f32 %v545_v31, %v389_v32 }
 0x142   : > { %393 = vst [vmem:[%s219_s15] sm:$0xff] %v390_v33 }
 0x147   : > { %v391_v34 = vpop.f32.mrf.mxu1 }
 0x148 PF: > { %s15_s18 = sadd.s32 1, %s554_s18  }
 0x149   : > { %p12_p4 = scmp.ge.s32.totalorder %s15_s18, 4  }
 0x14b   :  { %14 = sbr.rel (!%p12_p4) target bundleno = 1 (0x1), region = 70 }

</bundles_post_ra>
